<compile_context>
chip_gen: v5e
topology: v5e:2x2
jax: 0.10.0
libtpu: 0.0.40
codegen_flags: <defaults>
</compile_context>

<pallas_src>
import jax
import jax.numpy as jnp
from jax.experimental import pallas as pl
from jax.experimental.pallas import tpu as pltpu

# Module constants (from the PyTorch script)
N, D_IN, H, D_OUT = 64, 1000, 100, 10

_SUBLANE = 8                               # TPU sublane width (f32)
_SINGLE_STEP_X_BYTES = 8 * 1024 * 1024     # keep whole batch resident if x <= 8 MiB


def _two_layer_kernel(x_ref, w1t_ref, b1_ref, w2t_ref, b2_ref, out_ref):
    # x tile : (bn, D_in)
    # w1t    : (D_in, H)
    # b1     : (1, H)
    # w2t    : (H, D_out)
    # b2     : (1, D_out)
    x = x_ref[...]
    # linear1: x @ W1^T + b1, then clamp(min=0)  (ReLU)
    h = jnp.dot(x, w1t_ref[...], preferred_element_type=jnp.float32)
    h = jnp.maximum(h + b1_ref[...], 0.0)
    # linear2: h_relu @ W2^T + b2
    y = jnp.dot(h, w2t_ref[...], preferred_element_type=jnp.float32)
    out_ref[...] = (y + b2_ref[...]).astype(out_ref.dtype)


def prepare_params(w1, b1, w2, b2):
    """One-time (init-time) re-layout of PyTorch-layout Linear parameters.

    w1: (H, D_in), b1: (H,), w2: (D_out, H), b2: (D_out,)
    Returns (w1t, b1r, w2t, b2r) with weights transposed to
    (in_features, out_features) and biases lifted to (1, out), so the forward
    hot path contains no transpose/reshape launches at all.
    """
    h, _ = w1.shape
    d_out = w2.shape[0]
    return (jnp.transpose(w1),        # (D_in, H)
            b1.reshape(1, h),         # (1, H)
            jnp.transpose(w2),        # (H, D_out)
            b2.reshape(1, d_out))     # (1, D_out)


def _pick_block_n(n, d_in, cap=512):
    """Row-tile size for the batch dimension.

    For anything that fits comfortably in VMEM (the common case, including
    the module's N=64) return n -> a single grid step: there is nothing to
    pipeline, and splitting only adds per-step overhead (and on v7x would
    duplicate the weight DMA per core).  Only for genuinely large batches
    (x tile > 8 MiB) fall back to sublane-aligned row tiles that evenly
    divide n."""
    x_bytes = n * d_in * 4
    if x_bytes <= _SINGLE_STEP_X_BYTES or n % _SUBLANE != 0 or n < 2 * _SUBLANE:
        return n
    bn = (min(cap, n // 2) // _SUBLANE) * _SUBLANE
    while bn >= _SUBLANE:
        if n % bn == 0:
            return bn
        bn -= _SUBLANE
    return n


def two_layer_net(x, w1t, b1r, w2t, b2r):
    """Forward pass.  x: (N, D_in) f32; params from prepare_params().

    Returns y_pred: (N, D_out) f32 — same semantics as the PyTorch module.
    """
    n, d_in = x.shape
    hdim = w1t.shape[1]
    d_out = w2t.shape[1]

    cost = pl.CostEstimate(
        flops=2 * n * d_in * hdim + 2 * n * hdim * d_out,
        transcendentals=0,
        bytes_accessed=4 * (n * d_in + d_in * hdim + hdim
                            + hdim * d_out + d_out + n * d_out),
    )

    bn = _pick_block_n(n, d_in)

    if bn == n:
        # Single-step path (used at the module's shapes): no grid, no
        # index_maps, everything resident in VMEM, one kernel invocation,
        # no megacore split.
        return pl.pallas_call(
            _two_layer_kernel,
            out_shape=jax.ShapeDtypeStruct((n, d_out), jnp.float32),
            cost_estimate=cost,
        )(x, w1t, b1r, w2t, b2r)

    # Multi-step path: only reached when the x tile alone exceeds a few MB.
    grid_steps = n // bn
    const2 = lambda i: (0, 0)  # noqa: E731  (weights stay resident)
    # Only fork across TensorCores when each core gets >= 2 row tiles;
    # otherwise the split just duplicates the weight DMA per core (v7x).
    semantics = ("parallel",) if grid_steps >= 4 else ("arbitrary",)
    return pl.pallas_call(
        _two_layer_kernel,
        out_shape=jax.ShapeDtypeStruct((n, d_out), jnp.float32),
        grid=(grid_steps,),
        in_specs=[
            # x: stream row tiles across the batch grid axis (double-buffered).
            pl.BlockSpec((bn, d_in), lambda i: (i, 0)),
            # weights / biases: constant block index, DMA'd once, and
            # single-buffered — no dead second VMEM copy of the weights.
            pl.BlockSpec((d_in, hdim), const2, pipeline_mode=pl.Buffered(1)),
            pl.BlockSpec((1, hdim), const2, pipeline_mode=pl.Buffered(1)),
            pl.BlockSpec((hdim, d_out), const2, pipeline_mode=pl.Buffered(1)),
            pl.BlockSpec((1, d_out), const2, pipeline_mode=pl.Buffered(1)),
        ],
        out_specs=pl.BlockSpec((bn, d_out), lambda i: (i, 0)),
        compiler_params=pltpu.CompilerParams(
            dimension_semantics=semantics,
            vmem_limit_bytes=64 * 1024 * 1024,
        ),
        cost_estimate=cost,
    )(x, w1t, b1r, w2t, b2r)


def _reference(x, w1, b1, w2, b2):
    h_relu = jnp.maximum(x @ w1.T + b1, 0.0)
    return h_relu @ w2.T + b2


if __name__ == "__main__":
    key = jax.random.PRNGKey(0)
    kx, kw1, kb1, kw2, kb2 = jax.random.split(key, 5)

    # Input (like torch.randn(N, D_in))
    x = jax.random.normal(kx, (N, D_IN), dtype=jnp.float32)

    # Deterministic parameter init mimicking torch.nn.Linear:
    # U(-1/sqrt(in_features), 1/sqrt(in_features)) for weight and bias.
    bound1 = 1.0 / jnp.sqrt(float(D_IN))
    w1 = jax.random.uniform(kw1, (H, D_IN), jnp.float32, -bound1, bound1)
    b1 = jax.random.uniform(kb1, (H,), jnp.float32, -bound1, bound1)
    bound2 = 1.0 / jnp.sqrt(float(H))
    w2 = jax.random.uniform(kw2, (D_OUT, H), jnp.float32, -bound2, bound2)
    b2 = jax.random.uniform(kb2, (D_OUT,), jnp.float32, -bound2, bound2)

    # One-time parameter re-layout, OUTSIDE the forward hot path.
    params = prepare_params(w1, b1, w2, b2)
    params = jax.tree_util.tree_map(jax.block_until_ready, params)

    y = two_layer_net(x, *params)
    jax.block_until_ready(y)

    y_ref = _reference(x, w1, b1, w2, b2)
    assert y.shape == (N, D_OUT) and y.dtype == jnp.float32
    assert jnp.allclose(y, y_ref, atol=1e-4, rtol=1e-4)

    print("KERNEL_OK")
</pallas_src>

<mosaic_0001>
module attributes {stable_mosaic.version = 11 : i64} {
  func.func @_two_layer_kernel(%arg0: memref<64x1000xf32, #tpu.memory_space<vmem>>, %arg1: memref<1000x100xf32, #tpu.memory_space<vmem>>, %arg2: memref<1x100xf32, #tpu.memory_space<vmem>>, %arg3: memref<100x10xf32, #tpu.memory_space<vmem>>, %arg4: memref<1x10xf32, #tpu.memory_space<vmem>>, %arg5: memref<64x10xf32, #tpu.memory_space<vmem>>) attributes {dimension_semantics = [], scalar_prefetch = 0 : i64, scratch_operands = 0 : i64, tpu.core_type = #tpu.core_type<tc>} {
    %c0 = arith.constant 0 : index
    %c0_0 = arith.constant 0 : index
    %0 = vector.load %arg0[%c0, %c0_0] : memref<64x1000xf32, #tpu.memory_space<vmem>>, vector<64x1000xf32>
    %c0_1 = arith.constant 0 : index
    %c0_2 = arith.constant 0 : index
    %1 = vector.load %arg1[%c0_1, %c0_2] : memref<1000x100xf32, #tpu.memory_space<vmem>>, vector<1000x100xf32>
    %cst = arith.constant dense<0.000000e+00> : vector<64x100xf32>
    %2 = tpu.matmul %0, %1, %cst {dimension_numbers = #tpu.dot_dimension_numbers<[1], [0], [0], [1], [0, 0, 1, 1], [], []>} : vector<64x1000xf32>, vector<1000x100xf32>, vector<64x100xf32> -> vector<64x100xf32>
    %c0_3 = arith.constant 0 : index
    %c0_4 = arith.constant 0 : index
    %3 = vector.load %arg2[%c0_3, %c0_4] : memref<1x100xf32, #tpu.memory_space<vmem>>, vector<1x100xf32>
    %4 = vector.broadcast %3 : vector<1x100xf32> to vector<64x100xf32>
    %5 = arith.addf %2, %4 : vector<64x100xf32>
    %cst_5 = arith.constant 0.000000e+00 : f32
    %6 = vector.broadcast %cst_5 : f32 to vector<64x100xf32>
    %7 = arith.maximumf %5, %6 : vector<64x100xf32>
    %c0_6 = arith.constant 0 : index
    %c0_7 = arith.constant 0 : index
    %8 = vector.load %arg3[%c0_6, %c0_7] : memref<100x10xf32, #tpu.memory_space<vmem>>, vector<100x10xf32>
    %cst_8 = arith.constant dense<0.000000e+00> : vector<64x10xf32>
    %9 = tpu.matmul %7, %8, %cst_8 {dimension_numbers = #tpu.dot_dimension_numbers<[1], [0], [0], [1], [0, 0, 1, 1], [], []>} : vector<64x100xf32>, vector<100x10xf32>, vector<64x10xf32> -> vector<64x10xf32>
    %c0_9 = arith.constant 0 : index
    %c0_10 = arith.constant 0 : index
    %10 = vector.load %arg4[%c0_9, %c0_10] : memref<1x10xf32, #tpu.memory_space<vmem>>, vector<1x10xf32>
    %11 = vector.broadcast %10 : vector<1x10xf32> to vector<64x10xf32>
    %12 = arith.addf %9, %11 : vector<64x10xf32>
    %c0_11 = arith.constant 0 : index
    %c0_12 = arith.constant 0 : index
    %13 = vector.load %arg5[%c0_11, %c0_12] : memref<64x10xf32, #tpu.memory_space<vmem>>, vector<64x10xf32>
    tpu.vector_store %arg5[%c0_11, %c0_12], %12 {strides = array<i32>} : memref<64x10xf32, #tpu.memory_space<vmem>>, vector<64x10xf32>,
    return
  }
}

</mosaic_0001>

<bundles_post_ra>
// kernel: tpu_custom_call.1
= control target key start
LH: loop header
LB: loop body
LE: loop exit
PB: predicated region body
PF: predicated region fallthrough
CT: control target
= control target key end

     0   :  { %vm213_vm0 = vcmask 850944   ;;  %vm616_vm1 = vcmask 1043456   ;;  %vm591_vm2 = vcmask 818176   ;;  %vm661_vm3 = vcmask 80896   ;;  %s1506_s1 = inlined_call_operand.vmem [shape: f32[1000,100], index: 1, kind: input, shape index: {}]   ;;  %s1507_s2 = inlined_call_operand.vmem [shape: f32[1,100], index: 2, kind: input, shape index: {}]   ;;  %s1508_s0 = inlined_call_operand.vmem [shape: f32[64,1000], index: 0, kind: input, shape index: {}]   ;;  %s1509_s3 = inlined_call_operand.vmem [shape: f32[100,10], index: 3, kind: input, shape index: {}]   ;;  %s1510_s4 = inlined_call_operand.vmem [shape: f32[1,10], index: 4, kind: input, shape index: {}]   ;;  %s1511_s5 = inlined_call_operand.vmem [shape: f32[64,10], index: 5, kind: output, shape index: {}]  }
   0x1   :  { %v99_v0 = vld [vmem:[%s1506_s1 + $0x78] sm:$0xff]  ;;  %v98_v1 = vld [vmem:[%s1506_s1 + $0x70] sm:$0xff]  ;;  %v97_v2 = vld [vmem:[%s1506_s1 + $0x68] sm:$0xff] }
   0x2   :  { %691 = vmatpush.msra.mxu1 %v99_v0  ;;  %238 = vmatpush.msra.mxu0 %v99_v0  ;;  %v96_v3 = vld [vmem:[%s1506_s1 + $0x60] sm:$0xff]  ;;  %v131_v4 = vld [vmem:[%s1506_s1 + $0x178] sm:$0xff]  ;;  %v130_v5 = vld [vmem:[%s1506_s1 + $0x170] sm:$0xff] }
   0x3   :  { %v95_v6 = vld [vmem:[%s1506_s1 + $0x58] sm:$0xff]  ;;  %320 = vmatpush.msra.mxu2 %v131_v4  ;;  %v129_v8 = vld [vmem:[%s1506_s1 + $0x168] sm:$0xff]  ;;  %v146_v9 = vld [vmem:[%s1506_s1 + $0x1f0] sm:$0xff] }
   0x4   :  { %692 = vmatpush.msra.mxu1 %v98_v1  ;;  %239 = vmatpush.msra.mxu0 %v98_v1  ;;  %v147_v7 = vld [vmem:[%s1506_s1 + $0x1f8] sm:$0xff]  ;;  %v94_v10 = vld [vmem:[%s1506_s1 + $0x50] sm:$0xff]  ;;  %v128_v11 = vld [vmem:[%s1506_s1 + $0x160] sm:$0xff] }
   0x5   :  { %321 = vmatpush.msra.mxu2 %v130_v5  ;;  %361 = vmatpush.msra.mxu3 %v147_v7  ;;  %v145_v12 = vld [vmem:[%s1506_s1 + $0x1e8] sm:$0xff]  ;;  %v127_v14 = vld [vmem:[%s1506_s1 + $0x158] sm:$0xff]  ;;  %v144_v15 = vld [vmem:[%s1506_s1 + $0x1e0] sm:$0xff] }
   0x6   :  { %693 = vmatpush.msra.mxu1 %v97_v2  ;;  %240 = vmatpush.msra.mxu0 %v97_v2  ;;  %v93_v13 = vld [vmem:[%s1506_s1 + $0x48] sm:$0xff]  ;;  %v92_v16 = vld [vmem:[%s1506_s1 + $0x40] sm:$0xff]  ;;  %v126_v17 = vld [vmem:[%s1506_s1 + $0x150] sm:$0xff] }
   0x7   :  { %322 = vmatpush.msra.mxu2 %v129_v8  ;;  %362 = vmatpush.msra.mxu3 %v146_v9  ;;  %v143_v18 = vld [vmem:[%s1506_s1 + $0x1d8] sm:$0xff]  ;;  %v125_v20 = vld [vmem:[%s1506_s1 + $0x148] sm:$0xff]  ;;  %v142_v21 = vld [vmem:[%s1506_s1 + $0x1d0] sm:$0xff] }
   0x8   :  { %694 = vmatpush.msra.mxu1 %v96_v3  ;;  %241 = vmatpush.msra.mxu0 %v96_v3  ;;  %v91_v19 = vld [vmem:[%s1506_s1 + $0x38] sm:$0xff]  ;;  %v90_v22 = vld [vmem:[%s1506_s1 + $0x30] sm:$0xff]  ;;  %v124_v23 = vld [vmem:[%s1506_s1 + $0x140] sm:$0xff] }
   0x9   :  { %323 = vmatpush.msra.mxu2 %v128_v11  ;;  %363 = vmatpush.msra.mxu3 %v145_v12  ;;  %v141_v24 = vld [vmem:[%s1506_s1 + $0x1c8] sm:$0xff]  ;;  %v123_v26 = vld [vmem:[%s1506_s1 + $0x138] sm:$0xff]  ;;  %v140_v27 = vld [vmem:[%s1506_s1 + $0x1c0] sm:$0xff] }
   0xa   :  { %695 = vmatpush.msra.mxu1 %v95_v6  ;;  %242 = vmatpush.msra.mxu0 %v95_v6  ;;  %v89_v25 = vld [vmem:[%s1506_s1 + $0x28] sm:$0xff]  ;;  %v88_v28 = vld [vmem:[%s1506_s1 + $0x20] sm:$0xff]  ;;  %v122_v29 = vld [vmem:[%s1506_s1 + $0x130] sm:$0xff] }
   0xb   :  { %324 = vmatpush.msra.mxu2 %v127_v14  ;;  %364 = vmatpush.msra.mxu3 %v144_v15  ;;  %v139_v30 = vld [vmem:[%s1506_s1 + $0x1b8] sm:$0xff]  ;;  %v121_v32 = vld [vmem:[%s1506_s1 + $0x128] sm:$0xff]  ;;  %v138_v33 = vld [vmem:[%s1506_s1 + $0x1b0] sm:$0xff] }
   0xc   :  { %696 = vmatpush.msra.mxu1 %v94_v10  ;;  %243 = vmatpush.msra.mxu0 %v94_v10  ;;  %v87_v31 = vld [vmem:[%s1506_s1 + $0x18] sm:$0xff]  ;;  %v86_v34 = vld [vmem:[%s1506_s1 + $0x10] sm:$0xff]  ;;  %v120_v35 = vld [vmem:[%s1506_s1 + $0x120] sm:$0xff] }
   0xd   :  { %325 = vmatpush.msra.mxu2 %v126_v17  ;;  %365 = vmatpush.msra.mxu3 %v143_v18  ;;  %v137_v36 = vld [vmem:[%s1506_s1 + $0x1a8] sm:$0xff]  ;;  %v119_v38 = vld [vmem:[%s1506_s1 + $0x118] sm:$0xff]  ;;  %v136_v39 = vld [vmem:[%s1506_s1 + $0x1a0] sm:$0xff] }
   0xe   :  { %697 = vmatpush.msra.mxu1 %v93_v13  ;;  %244 = vmatpush.msra.mxu0 %v93_v13  ;;  %v85_v37 = vld [vmem:[%s1506_s1 + $0x8] sm:$0xff]  ;;  %v84_v40 = vld [vmem:[%s1506_s1] sm:$0xff]  ;;  %v115_v43 = vld [vmem:[%s1506_s1 + $0xf8] sm:$0xff] }
   0xf   :  { %326 = vmatpush.msra.mxu2 %v125_v20  ;;  %366 = vmatpush.msra.mxu3 %v142_v21  ;;  %v52_v41 = vld [vmem:[%s1508_s0 + $0x100] sm:$0xff]  ;;  %v163_v44 = vld [vmem:[%s1506_s1 + $0x278] sm:$0xff]  ;;  %v118_v45 = vld [vmem:[%s1506_s1 + $0x110] sm:$0xff] }
  0x10   :  { %698 = vmatpush.msra.mxu1 %v92_v16  ;;  %245 = vmatpush.msra.mxu0 %v92_v16  ;;  %v20_v42 = vld [vmem:[%s1508_s0] sm:$0xff]  ;;  %v135_v46 = vld [vmem:[%s1506_s1 + $0x198] sm:$0xff]  ;;  %v114_v47 = vld [vmem:[%s1506_s1 + $0xf0] sm:$0xff] }
  0x11   :  { %327 = vmatpush.msra.mxu2 %v124_v23  ;;  %367 = vmatpush.msra.mxu3 %v141_v24  ;;  %v162_v48 = vld [vmem:[%s1506_s1 + $0x270] sm:$0xff]  ;;  %v117_v49 = vld [vmem:[%s1506_s1 + $0x108] sm:$0xff]  ;;  %v116_v53 = vld [vmem:[%s1506_s1 + $0x100] sm:$0xff] }
  0x12   :  { %699 = vmatpush.msra.mxu1 %v91_v19  ;;  %246 = vmatpush.msra.mxu0 %v91_v19  ;;  %v134_v50 = vld [vmem:[%s1506_s1 + $0x190] sm:$0xff]  ;;  %v113_v51 = vld [vmem:[%s1506_s1 + $0xe8] sm:$0xff]  ;;  %v112_v55 = vld [vmem:[%s1506_s1 + $0xe0] sm:$0xff] }
  0x13   :  { %328 = vmatpush.msra.mxu2 %v123_v26  ;;  %368 = vmatpush.msra.mxu3 %v140_v27  ;;  %v161_v52 = vld [vmem:[%s1506_s1 + $0x268] sm:$0xff]  ;;  %v160_v56 = vld [vmem:[%s1506_s1 + $0x260] sm:$0xff]  ;;  %v111_v59 = vld [vmem:[%s1506_s1 + $0xd8] sm:$0xff] }
  0x14   :  { %700 = vmatpush.msra.mxu1 %v90_v22  ;;  %247 = vmatpush.msra.mxu0 %v90_v22  ;;  %v133_v54 = vld [vmem:[%s1506_s1 + $0x188] sm:$0xff]  ;;  %v60_v57 = vld [vmem:[%s1508_s0 + $0x140] sm:$0xff]  ;;  %v159_v60 = vld [vmem:[%s1506_s1 + $0x258] sm:$0xff] }
  0x15   :  { %329 = vmatpush.msra.mxu2 %v122_v29  ;;  %369 = vmatpush.msra.mxu3 %v139_v30  ;;  %v28_v58 = vld [vmem:[%s1508_s0 + $0x40] sm:$0xff]  ;;  %v22_v61 = vld [vmem:[%s1508_s0 + $0x10] sm:$0xff]  ;;  %v195_v1 = vld [vmem:[%s1506_s1 + $0x378] sm:$0xff] }
  0x16   :  { %701 = vmatpush.msra.mxu1 %v89_v25  ;;  %248 = vmatpush.msra.mxu0 %v89_v25  ;;  %v132_v62 = vld [vmem:[%s1506_s1 + $0x180] sm:$0xff]  ;;  %v110_v63 = vld [vmem:[%s1506_s1 + $0xd0] sm:$0xff]  ;;  %v23_v2 = vld [vmem:[%s1508_s0 + $0x18] sm:$0xff] }
  0x17   :  { %330 = vmatpush.msra.mxu2 %v121_v32  ;;  %370 = vmatpush.msra.mxu3 %v138_v33  ;;  %v158_v0 = vld [vmem:[%s1506_s1 + $0x250] sm:$0xff]  ;;  %v109_v3 = vld [vmem:[%s1506_s1 + $0xc8] sm:$0xff]  ;;  %v208_v5 = vld [vmem:[%s1506_s1 + $0x3e0] sm:$0xff] }
  0x18   :  { %702 = vmatpush.msra.mxu1 %v88_v28  ;;  %249 = vmatpush.msra.mxu0 %v88_v28  ;;  %v157_v4 = vld [vmem:[%s1506_s1 + $0x248] sm:$0xff]  ;;  %v194_v6 = vld [vmem:[%s1506_s1 + $0x370] sm:$0xff]  ;;  %v108_v7 = vld [vmem:[%s1506_s1 + $0xc0] sm:$0xff] }
  0x19   :  { %331 = vmatpush.msra.mxu2 %v120_v35  ;;  %371 = vmatpush.msra.mxu3 %v137_v36  ;;  %v156_v8 = vld [vmem:[%s1506_s1 + $0x240] sm:$0xff]  ;;  %v107_v11 = vld [vmem:[%s1506_s1 + $0xb8] sm:$0xff]  ;;  %v30_v14 = vld [vmem:[%s1508_s0 + $0x50] sm:$0xff] }
  0x1a   :  { %703 = vmatpush.msra.mxu1 %v87_v31  ;;  %250 = vmatpush.msra.mxu0 %v87_v31  ;;  %v68_v9 = vld [vmem:[%s1508_s0 + $0x180] sm:$0xff]  ;;  %v155_v12 = vld [vmem:[%s1506_s1 + $0x238] sm:$0xff]  ;;  %v106_v15 = vld [vmem:[%s1506_s1 + $0xb0] sm:$0xff] }
  0x1b   :  { %332 = vmatpush.msra.mxu2 %v119_v38  ;;  %372 = vmatpush.msra.mxu3 %v136_v39  ;;  %v36_v10 = vld [vmem:[%s1508_s0 + $0x80] sm:$0xff]  ;;  %v207_v13 = vld [vmem:[%s1506_s1 + $0x3d8] sm:$0xff]  ;;  %v154_v16 = vld [vmem:[%s1506_s1 + $0x230] sm:$0xff] }
  0x1c   :  { %704 = vmatpush.msra.mxu1 %v86_v34  ;;  %251 = vmatpush.msra.mxu0 %v86_v34  ;;  %v193_v17 = vld [vmem:[%s1506_s1 + $0x368] sm:$0xff]  ;;  %v31_v18 = vld [vmem:[%s1508_s0 + $0x58] sm:$0xff]  ;;  %v192_v21 = vld [vmem:[%s1506_s1 + $0x360] sm:$0xff] }
  0x1d   :  { %333 = vmatpush.msra.mxu2 %v118_v45  ;;  %373 = vmatpush.msra.mxu3 %v135_v46  ;;  %v105_v19 = vld [vmem:[%s1506_s1 + $0xa8] sm:$0xff]  ;;  %v206_v22 = vld [vmem:[%s1506_s1 + $0x3d0] sm:$0xff]  ;;  %v104_v23 = vld [vmem:[%s1506_s1 + $0xa0] sm:$0xff] }
  0x1e   :  { %705 = vmatpush.msra.mxu1 %v85_v37  ;;  %252 = vmatpush.msra.mxu0 %v85_v37  ;;  %v153_v20 = vld [vmem:[%s1506_s1 + $0x228] sm:$0xff]  ;;  %v152_v24 = vld [vmem:[%s1506_s1 + $0x220] sm:$0xff]  ;;  %v103_v27 = vld [vmem:[%s1506_s1 + $0x98] sm:$0xff] }
  0x1f   :  { %334 = vmatpush.msra.mxu2 %v117_v49  ;;  %374 = vmatpush.msra.mxu3 %v134_v50  ;;  %v76_v25 = vld [vmem:[%s1508_s0 + $0x1c0] sm:$0xff]  ;;  %v151_v28 = vld [vmem:[%s1506_s1 + $0x218] sm:$0xff]  ;;  %v38_v29 = vld [vmem:[%s1508_s0 + $0x90] sm:$0xff] }
  0x20   :  { %706 = vmatpush.msra.mxu1 %v84_v40  ;;  %253 = vmatpush.msra.mxu0 %v84_v40  ;;  %v44_v26 = vld [vmem:[%s1508_s0 + $0xc0] sm:$0xff]  ;;  %v205_v30 = vld [vmem:[%s1506_s1 + $0x3c8] sm:$0xff]  ;;  %v102_v31 = vld [vmem:[%s1506_s1 + $0x90] sm:$0xff] }
  0x21   :  { %266 = vmatmul.f32.vlgmr.msra.gmra.mxu1 %v52_v41  ;;  %254 = vmatmul.f32.vlgmr.msra.gmra.mxu0 %v20_v42  ;;  %v150_v32 = vld [vmem:[%s1506_s1 + $0x210] sm:$0xff]  ;;  %v191_v33 = vld [vmem:[%s1506_s1 + $0x358] sm:$0xff]  ;;  %v101_v35 = vld [vmem:[%s1506_s1 + $0x88] sm:$0xff] }
  0x22   :  { %279 = vmatpush.msrb.mxu1 %v115_v43  ;;  %402 = vmatpush.msrb.mxu0 %v163_v44  ;;  %v39_v34 = vld [vmem:[%s1508_s0 + $0x98] sm:$0xff]  ;;  %v149_v36 = vld [vmem:[%s1506_s1 + $0x208] sm:$0xff]  ;;  %v190_v37 = vld [vmem:[%s1506_s1 + $0x350] sm:$0xff] }
  0x23   :  { %335 = vmatpush.msra.mxu2 %v116_v53  ;;  %375 = vmatpush.msra.mxu3 %v133_v54  ;;  %v204_v38 = vld [vmem:[%s1506_s1 + $0x3c0] sm:$0xff]  ;;  %v21_v41 = vld [vmem:[%s1508_s0 + $0x8] sm:$0xff]  ;;  %v179_v43 = vld [vmem:[%s1506_s1 + $0x2f8] sm:$0xff] }
  0x24   :  { %280 = vmatpush.msrb.mxu1 %v114_v47  ;;  %403 = vmatpush.msrb.mxu0 %v162_v48  ;;  %v100_v39 = vld [vmem:[%s1506_s1 + $0x80] sm:$0xff]  ;;  %v189_v44 = vld [vmem:[%s1506_s1 + $0x348] sm:$0xff]  ;;  %v46_v45 = vld [vmem:[%s1508_s0 + $0xd0] sm:$0xff] }
  0x25   :  { %336 = vmatmul.f32.vlgmr.msra.gmra.mxu2 %v22_v61  ;;  %376 = vmatpush.msra.mxu3 %v132_v62  ;;  %v148_v40 = vld [vmem:[%s1506_s1 + $0x200] sm:$0xff]  ;;  %v203_v46 = vld [vmem:[%s1506_s1 + $0x3b8] sm:$0xff]  ;;  %v178_v47 = vld [vmem:[%s1506_s1 + $0x2f0] sm:$0xff] }
  0x26   :  { %281 = vmatpush.msrb.mxu1 %v113_v51  ;;  %404 = vmatpush.msrb.mxu0 %v161_v52  ;;  %v24_v42 = vld [vmem:[%s1508_s0 + $0x20] sm:$0xff]  ;;  %v47_v49 = vld [vmem:[%s1508_s0 + $0xd8] sm:$0xff]  ;;  %v177_v50 = vld [vmem:[%s1506_s1 + $0x2e8] sm:$0xff] }
  0x27   :  { %484 = vmatpush.msrb.mxu2 %v195_v1  ;;  %377 = vmatmul.f32.vlgmr.msra.gmra.mxu3 %v23_v2  ;;  %v188_v48 = vld [vmem:[%s1506_s1 + $0x340] sm:$0xff]  ;;  %v187_v51 = vld [vmem:[%s1506_s1 + $0x338] sm:$0xff]  ;;  %v202_v52 = vld [vmem:[%s1506_s1 + $0x3b0] sm:$0xff] }
  0x28   :  { %282 = vmatpush.msrb.mxu1 %v112_v55  ;;  %405 = vmatpush.msrb.mxu0 %v160_v56  ;;  %v176_v53 = vld [vmem:[%s1506_s1 + $0x2e0] sm:$0xff]  ;;  %v186_v54 = vld [vmem:[%s1506_s1 + $0x330] sm:$0xff]  ;;  %v29_v55 = vld [vmem:[%s1508_s0 + $0x48] sm:$0xff] }
  0x29   :  { %269 = vmatmul.f32.gmra.mxu1 %v60_v57  ;;  %257 = vmatmul.f32.gmra.mxu0 %v28_v58  ;;  %v32_v56 = vld [vmem:[%s1508_s0 + $0x60] sm:$0xff]  ;;  %v175_v57 = vld [vmem:[%s1506_s1 + $0x2d8] sm:$0xff]  ;;  %v201_v58 = vld [vmem:[%s1506_s1 + $0x3a8] sm:$0xff] }
  0x2a   :  { %283 = vmatpush.msrb.mxu1 %v111_v59  ;;  %406 = vmatpush.msrb.mxu0 %v159_v60  ;;  %v54_v59 = vld [vmem:[%s1508_s0 + $0x110] sm:$0xff]  ;;  %v185_v61 = vld [vmem:[%s1506_s1 + $0x328] sm:$0xff]  ;;  %v55_v62 = vld [vmem:[%s1508_s0 + $0x118] sm:$0xff] }
  0x2b   :  { %528 = vmatpush.msrb.mxu3 %v208_v5  ;;  %485 = vmatpush.msrb.mxu2 %v194_v6  ;;  %v174_v60 = vld [vmem:[%s1506_s1 + $0x2d0] sm:$0xff]  ;;  %v184_v1 = vld [vmem:[%s1506_s1 + $0x320] sm:$0xff]  ;;  %v171_v6 = vld [vmem:[%s1506_s1 + $0x2b8] sm:$0xff] }
  0x2c   :  { %284 = vmatpush.msrb.mxu1 %v110_v63  ;;  %407 = vmatpush.msrb.mxu0 %v158_v0  ;;  %v173_v63 = vld [vmem:[%s1506_s1 + $0x2c8] sm:$0xff]  ;;  %v200_v0 = vld [vmem:[%s1506_s1 + $0x3a0] sm:$0xff] }
  0x2d   :  { %529 = vmatpush.msrb.mxu3 %v207_v13  ;;  %339 = vmatmul.f32.gmra.mxu2 %v30_v14  ;;  %v172_v2 = vld [vmem:[%s1506_s1 + $0x2c0] sm:$0xff]  ;;  %v169_v13 = vld [vmem:[%s1506_s1 + $0x2a8] sm:$0xff] }
  0x2e   :  { %285 = vmatpush.msrb.mxu1 %v109_v3  ;;  %408 = vmatpush.msrb.mxu0 %v157_v4  ;;  %v199_v3 = vld [vmem:[%s1506_s1 + $0x398] sm:$0xff]  ;;  %v37_v4 = vld [vmem:[%s1508_s0 + $0x88] sm:$0xff]  ;;  %v40_v5 = vld [vmem:[%s1508_s0 + $0xa0] sm:$0xff] }
  0x2f   :  { %486 = vmatpush.msrb.mxu2 %v193_v17  ;;  %380 = vmatmul.f32.gmra.mxu3 %v31_v18  ;;  %v181_v14 = vld [vmem:[%s1506_s1 + $0x308] sm:$0xff]  ;;  %v48_v18 = vld [vmem:[%s1508_s0 + $0xe0] sm:$0xff] }
  0x30   :  { %286 = vmatpush.msrb.mxu1 %v108_v7  ;;  %409 = vmatpush.msrb.mxu0 %v156_v8  ;;  %v183_v7 = vld [vmem:[%s1506_s1 + $0x318] sm:$0xff]  ;;  %v62_v8 = vld [vmem:[%s1508_s0 + $0x150] sm:$0xff]  ;;  %v45_v17 = vld [vmem:[%s1508_s0 + $0xc8] sm:$0xff] }
  0x31   :  { %272 = vmatmul.f32.gmra.mxu1 %v68_v9  ;;  %260 = vmatmul.f32.gmra.mxu0 %v36_v10  ;;  %v170_v9 = vld [vmem:[%s1506_s1 + $0x2b0] sm:$0xff] }
  0x32   :  { %287 = vmatpush.msrb.mxu1 %v107_v11  ;;  %410 = vmatpush.msrb.mxu0 %v155_v12  ;;  %v182_v10 = vld [vmem:[%s1506_s1 + $0x310] sm:$0xff]  ;;  %v63_v12 = vld [vmem:[%s1508_s0 + $0x158] sm:$0xff] }
  0x33   :  { %487 = vmatpush.msrb.mxu2 %v192_v21  ;;  %530 = vmatpush.msrb.mxu3 %v206_v22  ;;  %v198_v11 = vld [vmem:[%s1506_s1 + $0x390] sm:$0xff]  ;;  %v180_v22 = vld [vmem:[%s1506_s1 + $0x300] sm:$0xff] }
  0x34   :  { %288 = vmatpush.msrb.mxu1 %v106_v15  ;;  %411 = vmatpush.msrb.mxu0 %v154_v16  ;;  %v197_v15 = vld [vmem:[%s1506_s1 + $0x388] sm:$0xff]  ;;  %v168_v16 = vld [vmem:[%s1506_s1 + $0x2a0] sm:$0xff]  ;;  %v166_v21 = vld [vmem:[%s1506_s1 + $0x290] sm:$0xff] }
  0x35   :  { %342 = vmatmul.f32.gmra.mxu2 %v38_v29  ;;  %531 = vmatpush.msrb.mxu3 %v205_v30  ;;  %v78_v29 = vld [vmem:[%s1508_s0 + $0x1d0] sm:$0xff]  ;;  %v79_v30 = vld [vmem:[%s1508_s0 + $0x1d8] sm:$0xff] }
  0x36   :  { %289 = vmatpush.msrb.mxu1 %v105_v19  ;;  %412 = vmatpush.msrb.mxu0 %v153_v20  ;;  %v167_v19 = vld [vmem:[%s1506_s1 + $0x298] sm:$0xff]  ;;  %v70_v20 = vld [vmem:[%s1508_s0 + $0x190] sm:$0xff] }
  0x37   :  { %488 = vmatpush.msrb.mxu2 %v191_v33  ;;  %383 = vmatmul.f32.gmra.mxu3 %v39_v34  ;;  %v26_v33 = vld [vmem:[%s1508_s0 + $0x30] sm:$0xff]  ;;  %v27_v34 = vld [vmem:[%s1508_s0 + $0x38] sm:$0xff] }
  0x38   :  { %290 = vmatpush.msrb.mxu1 %v104_v23  ;;  %413 = vmatpush.msrb.mxu0 %v152_v24  ;;  %v196_v23 = vld [vmem:[%s1506_s1 + $0x380] sm:$0xff]  ;;  %v71_v24 = vld [vmem:[%s1508_s0 + $0x198] sm:$0xff] }
  0x39   :  { %275 = vmatmul.f32.gmra.mxu1 %v76_v25  ;;  %263 = vmatmul.f32.gmra.mxu0 %v44_v26  ;;  %v165_v25 = vld [vmem:[%s1506_s1 + $0x288] sm:$0xff]  ;;  %v164_v26 = vld [vmem:[%s1506_s1 + $0x280] sm:$0xff] }
  0x3a   :  { %291 = vmatpush.msrb.mxu1 %v103_v27  ;;  %414 = vmatpush.msrb.mxu0 %v151_v28  ;;  %v53_v27 = vld [vmem:[%s1508_s0 + $0x108] sm:$0xff]  ;;  %v56_v28 = vld [vmem:[%s1508_s0 + $0x120] sm:$0xff] }
  0x3b   :  { %489 = vmatpush.msrb.mxu2 %v190_v37  ;;  %532 = vmatpush.msrb.mxu3 %v204_v38  ;;  %v34_v37 = vld [vmem:[%s1508_s0 + $0x70] sm:$0xff]  ;;  %v35_v38 = vld [vmem:[%s1508_s0 + $0x78] sm:$0xff] }
  0x3c   :  { %292 = vmatpush.msrb.mxu1 %v102_v31  ;;  %415 = vmatpush.msrb.mxu0 %v150_v32  ;;  %v61_v31 = vld [vmem:[%s1508_s0 + $0x148] sm:$0xff]  ;;  %v64_v32 = vld [vmem:[%s1508_s0 + $0x160] sm:$0xff] }
  0x3d   :  { %490 = vmatpush.msrb.mxu2 %v189_v44  ;;  %533 = vmatpush.msrb.mxu3 %v203_v46  ;;  %v50_v44 = vld [vmem:[%s1508_s0 + $0xf0] sm:$0xff]  ;;  %v33_v46 = vld [vmem:[%s1508_s0 + $0x68] sm:$0xff] }
  0x3e   :  { %293 = vmatpush.msrb.mxu1 %v101_v35  ;;  %416 = vmatpush.msrb.mxu0 %v149_v36  ;;  %v69_v35 = vld [vmem:[%s1508_s0 + $0x188] sm:$0xff]  ;;  %v72_v36 = vld [vmem:[%s1508_s0 + $0x1a0] sm:$0xff] }
  0x3f   :  { %345 = vmatmul.f32.gmra.mxu2 %v46_v45  ;;  %386 = vmatmul.f32.gmra.mxu3 %v47_v49  ;;  %v51_v45 = vld [vmem:[%s1508_s0 + $0xf8] sm:$0xff]  ;;  %v41_v49 = vld [vmem:[%s1508_s0 + $0xa8] sm:$0xff] }
  0x40   :  { %294 = vmatpush.msrb.mxu1 %v100_v39  ;;  %417 = vmatpush.msrb.mxu0 %v148_v40  ;;  %v77_v39 = vld [vmem:[%s1508_s0 + $0x1c8] sm:$0xff]  ;;  %v80_v40 = vld [vmem:[%s1508_s0 + $0x1e0] sm:$0xff] }
  0x41   :  { %295 = vmatmul.f32.vlgmr.msrb.gmra.mxu1 %v21_v41  ;;  %418 = vmatmul.f32.vlgmr.msrb.gmra.mxu0 %v24_v42  ;;  %v42_v41 = vld [vmem:[%s1508_s0 + $0xb0] sm:$0xff]  ;;  %v43_v42 = vld [vmem:[%s1508_s0 + $0xb8] sm:$0xff] }
  0x42   :  { %443 = vmatpush.msra.mxu1 %v179_v43  ;;  %491 = vmatpush.msrb.mxu2 %v188_v48  ;;  %v25_v43 = vld [vmem:[%s1508_s0 + $0x28] sm:$0xff]  ;;  %v59_v48 = vld [vmem:[%s1508_s0 + $0x138] sm:$0xff] }
  0x43   :  { %534 = vmatpush.msrb.mxu3 %v202_v52  ;;  %v49_v52 = vld [vmem:[%s1508_s0 + $0xe8] sm:$0xff] }
  0x44   :  { %444 = vmatpush.msra.mxu1 %v178_v47  ;;  %492 = vmatpush.msrb.mxu2 %v187_v51  ;;  %v58_v47 = vld [vmem:[%s1508_s0 + $0x130] sm:$0xff]  ;;  %v67_v51 = vld [vmem:[%s1508_s0 + $0x178] sm:$0xff] }
  0x45   :  { %535 = vmatpush.msrb.mxu3 %v201_v58  ;;  %v83_v58 = vld [vmem:[%s1508_s0 + $0x1f8] sm:$0xff] }
  0x46   :  { %445 = vmatpush.msra.mxu1 %v177_v50  ;;  %493 = vmatpush.msrb.mxu2 %v186_v54  ;;  %v66_v50 = vld [vmem:[%s1508_s0 + $0x170] sm:$0xff]  ;;  %v75_v54 = vld [vmem:[%s1508_s0 + $0x1b8] sm:$0xff] }
  0x47   :  { %348 = vmatmul.f32.gmra.mxu2 %v54_v59  ;;  %389 = vmatmul.f32.gmra.mxu3 %v55_v62  ;;  %v73_v62 = vld [vmem:[%s1508_s0 + $0x1a8] sm:$0xff] }
  0x48   :  { %446 = vmatpush.msra.mxu1 %v176_v53  ;;  %494 = vmatpush.msrb.mxu2 %v185_v61  ;;  %v74_v53 = vld [vmem:[%s1508_s0 + $0x1b0] sm:$0xff] }
  0x49   :  { %298 = vmatmul.f32.gmra.mxu1 %v29_v55  ;;  %421 = vmatmul.f32.gmra.mxu0 %v32_v56  ;;  %v57_v56 = vld [vmem:[%s1508_s0 + $0x128] sm:$0xff] }
  0x4a   :  { %447 = vmatpush.msra.mxu1 %v175_v57  ;;  %536 = vmatpush.msrb.mxu3 %v200_v0  ;;  %v82_v57 = vld [vmem:[%s1508_s0 + $0x1f0] sm:$0xff] }
  0x4b   :  { %495 = vmatpush.msrb.mxu2 %v184_v1 }
  0x4c   :  { %448 = vmatpush.msra.mxu1 %v174_v60  ;;  %537 = vmatpush.msrb.mxu3 %v199_v3  ;;  %v65_v60 = vld [vmem:[%s1508_s0 + $0x168] sm:$0xff] }
  0x4d   :  { %496 = vmatpush.msrb.mxu2 %v183_v7 }
  0x4e   :  { %449 = vmatpush.msra.mxu1 %v173_v63  ;;  %538 = vmatpush.msrb.mxu3 %v198_v11 }
  0x4f   :  { %351 = vmatmul.f32.gmra.mxu2 %v62_v8  ;;  %392 = vmatmul.f32.gmra.mxu3 %v63_v12 }
  0x50   :  { %450 = vmatpush.msra.mxu1 %v172_v2  ;;  %497 = vmatpush.msrb.mxu2 %v182_v10  ;;  %v81_v2 = vld [vmem:[%s1508_s0 + $0x1e8] sm:$0xff] }
  0x51   :  { %301 = vmatmul.f32.gmra.mxu1 %v37_v4  ;;  %424 = vmatmul.f32.gmra.mxu0 %v40_v5  ;;  %v586_v5 = vld [vmem:[%s1509_s3 + $0x60] sm:$0xf] }
  0x52   :  { %451 = vmatpush.msra.mxu1 %v171_v6  ;;  %498 = vmatpush.msrb.mxu2 %v181_v14 }
  0x53   :  { %539 = vmatpush.msrb.mxu3 %v197_v15  ;;  %682 = vmatpush.msk.msra.mxu0 %vm616_vm1, %v586_v5  ;;  %v583_v15 = vld [vmem:[%s1509_s3 + $0x48] sm:$0xff] }
  0x54   :  { %452 = vmatpush.msra.mxu1 %v170_v9  ;;  %499 = vmatpush.msrb.mxu2 %v180_v22  ;;  %v585_v9 = vld [vmem:[%s1509_s3 + $0x58] sm:$0xff] }
  0x55   :  { %540 = vmatpush.msrb.mxu3 %v196_v23  ;;  %624 = vmatpush.msra.mxu0 %v585_v9  ;;  %v581_v23 = vld [vmem:[%s1509_s3 + $0x38] sm:$0xff] }
  0x56   :  { %453 = vmatpush.msra.mxu1 %v169_v13  ;;  %707 = vmatpush.msk.msra.mxu2 %vm616_vm1, %v586_v5  ;;  %v584_v13 = vld [vmem:[%s1509_s3 + $0x50] sm:$0xff] }
  0x57   :  { %354 = vmatmul.f32.gmra.mxu2 %v70_v20  ;;  %395 = vmatmul.f32.gmra.mxu3 %v71_v24  ;;  %v582_v20 = vld [vmem:[%s1509_s3 + $0x40] sm:$0xff] }
  0x58   :  { %454 = vmatpush.msra.mxu1 %v168_v16  ;;  %708 = vmatpush.msra.mxu2 %v585_v9 }
  0x59   :  { %304 = vmatmul.f32.gmra.mxu1 %v45_v17  ;;  %427 = vmatmul.f32.gmra.mxu0 %v48_v18 }
  0x5a   :  { %455 = vmatpush.msra.mxu1 %v167_v19  ;;  %625 = vmatpush.msra.mxu0 %v584_v13 }
  0x5b   :  { %709 = vmatpush.msra.mxu2 %v584_v13 }
  0x5c   :  { %456 = vmatpush.msra.mxu1 %v166_v21  ;;  %626 = vmatpush.msra.mxu0 %v583_v15 }
  0x5d   :  { %710 = vmatpush.msra.mxu2 %v583_v15 }
  0x5e   :  { %457 = vmatpush.msra.mxu1 %v165_v25  ;;  %627 = vmatpush.msra.mxu0 %v582_v20 }
  0x5f   :  { %357 = vmatmul.f32.gmra.mxu2 %v78_v29  ;;  %398 = vmatmul.f32.gmra.mxu3 %v79_v30 }
  0x60   :  { %458 = vmatpush.msra.mxu1 %v164_v26  ;;  %711 = vmatpush.msra.mxu2 %v582_v20  ;;  %v580_v26 = vld [vmem:[%s1509_s3 + $0x30] sm:$0xff] }
  0x61   :  { %307 = vmatmul.f32.gmra.mxu1 %v53_v27  ;;  %430 = vmatmul.f32.gmra.mxu0 %v56_v28  ;;  %v579_v27 = vld [vmem:[%s1509_s3 + $0x28] sm:$0xff]  ;;  %v578_v28 = vld [vmem:[%s1509_s3 + $0x20] sm:$0xff] }
  0x62   :  { %628 = vmatpush.msra.mxu0 %v581_v23  ;;  %712 = vmatpush.msra.mxu2 %v581_v23 }
  0x64   :  { %629 = vmatpush.msra.mxu0 %v580_v26  ;;  %713 = vmatpush.msra.mxu2 %v580_v26 }
  0x66   :  { %630 = vmatpush.msra.mxu0 %v579_v27  ;;  %714 = vmatpush.msra.mxu2 %v579_v27 }
  0x67   :  { %500 = vmatmul.f32.vlgmr.msrb.gmra.mxu2 %v26_v33  ;;  %674 = vmatmul.msk.f32.vlgmr.msrb.gmra.mxu3 %vm213_vm0, %v27_v34  ;;  %v576_v33 = vld [vmem:[%s1509_s3 + $0x10] sm:$0xff] }
  0x68   :  { %631 = vmatpush.msra.mxu0 %v578_v28  ;;  %715 = vmatpush.msra.mxu2 %v578_v28 }
  0x69   :  { %310 = vmatmul.f32.gmra.mxu1 %v61_v31  ;;  %433 = vmatmul.f32.gmra.mxu0 %v64_v32  ;;  %v577_v31 = vld [vmem:[%s1509_s3 + $0x18] sm:$0xff] }
  0x6a   :  { %632 = vmatpush.msra.mxu0 %v577_v31  ;;  %716 = vmatpush.msra.mxu2 %v577_v31 }
  0x6c   :  { %633 = vmatpush.msra.mxu0 %v576_v33  ;;  %717 = vmatpush.msra.mxu2 %v576_v33 }
  0x6f   :  { %503 = vmatmul.f32.gmra.mxu2 %v34_v37  ;;  %675 = vmatmul.msk.f32.gmra.mxu3 %vm213_vm0, %v35_v38 }
  0x71   :  { %313 = vmatmul.f32.gmra.mxu1 %v69_v35  ;;  %436 = vmatmul.f32.gmra.mxu0 %v72_v36  ;;  %v575_v35 = vld [vmem:[%s1509_s3 + $0x8] sm:$0xff]  ;;  %v574_v36 = vld [vmem:[%s1509_s3] sm:$0xff] }
  0x72   :  { %634 = vmatpush.msra.mxu0 %v575_v35  ;;  %718 = vmatpush.msra.mxu2 %v575_v35 }
  0x74   :  { %635 = vmatpush.msra.mxu0 %v574_v36  ;;  %719 = vmatpush.msra.mxu2 %v574_v36 }
  0x77   :  { %506 = vmatmul.f32.gmra.mxu2 %v42_v41  ;;  %676 = vmatmul.msk.f32.gmra.mxu3 %vm213_vm0, %v43_v42 }
  0x79   :  { %316 = vmatmul.f32.gmra.mxu1 %v77_v39  ;;  %439 = vmatmul.f32.gmra.mxu0 %v80_v40  ;;  %v1421_v40 = vld [vmem:[%s1507_s2] ss:$0 sm:$0xff] }
  0x7f   :  { %509 = vmatmul.f32.gmra.mxu2 %v50_v44  ;;  %677 = vmatmul.msk.f32.gmra.mxu3 %vm213_vm0, %v51_v45 }
  0x81   :  { %459 = vmatmul.f32.vlgmr.msra.gmra.mxu1 %v25_v43 }
  0x87   :  { %512 = vmatmul.f32.gmra.mxu2 %v58_v47  ;;  %678 = vmatmul.msk.f32.gmra.mxu3 %vm213_vm0, %v59_v48 }
  0x89   :  { %462 = vmatmul.f32.gmra.mxu1 %v33_v46 }
  0x8f   :  { %515 = vmatmul.f32.gmra.mxu2 %v66_v50  ;;  %679 = vmatmul.msk.f32.gmra.mxu3 %vm213_vm0, %v67_v51 }
  0x91   :  { %465 = vmatmul.f32.gmra.mxu1 %v41_v49 }
  0x97   :  { %518 = vmatmul.f32.gmra.mxu2 %v74_v53  ;;  %680 = vmatmul.msk.f32.gmra.mxu3 %vm213_vm0, %v75_v54 }
  0x99   :  { %468 = vmatmul.f32.gmra.mxu1 %v49_v52 }
  0x9e   :  { %v1308_v55 = vpop.f32.mrf.mxu1  ;;  %v255_v10 = vpop.f32.mrf.mxu0 }
  0x9f   :  { %521 = vmatmul.f32.gmra.mxu2 %v82_v57  ;;  %681 = vmatmul.msk.f32.gmra.mxu3 %vm213_vm0, %v83_v58  ;;  %v256_v42 = vadd.f32 %v1421_v40, %v255_v10 }
  0xa1   :  { %471 = vmatmul.f32.gmra.mxu1 %v57_v56 }
  0xa6   :  { %v1320_v59 = vpop.f32.mrf.mxu1  ;;  %v258_v16 = vpop.f32.mrf.mxu0 }
  0xa7   :  { %v259_v47 = vadd.f32 %v1421_v40, %v258_v16 }
  0xa8   :  { %v1330_v63 = vpop.f32.mrf.mxu2 }
  0xa9   :  { %474 = vmatmul.f32.gmra.mxu1 %v65_v60 }
  0xaa   :  { %v1332_v0 = vpop.f32.mrf.mxu3 }
  0xae   :  { %v1325_v61 = vpop.f32.mrf.mxu1  ;;  %v261_v24 = vpop.f32.mrf.mxu0 }
  0xaf   :  { %v262_v56 = vadd.f32 %v1421_v40, %v261_v24 }
  0xb0   :  { %v1339_v3 = vpop.f32.mrf.mxu2 }
  0xb1   :  { %477 = vmatmul.f32.gmra.mxu1 %v73_v62 }
  0xb2   :  { %v1341_v4 = vpop.f32.mrf.mxu3 }
  0xb6   :  { %v1334_v1 = vpop.f32.mrf.mxu1  ;;  %v264_v34 = vpop.f32.mrf.mxu0 }
  0xb7   :  { %v265_v10 = vadd.f32 %v1421_v40, %v264_v34 }
  0xb8   :  { %v1348_v7 = vpop.f32.mrf.mxu2 }
  0xb9   :  { %480 = vmatmul.f32.gmra.mxu1 %v81_v2 }
  0xba   :  { %v1350_v8 = vpop.f32.mrf.mxu3 }
  0xbe   :  { %v1346_v6 = vpop.f32.mrf.mxu1  ;;  %v419_v41 = vpop.f32.mrf.mxu0 }
  0xbf   :  { %v297_v45 = vadd.f32 %v1346_v6, %v256_v42 }
  0xc1   :  { %v338_v48 = vadd.f32 %v1330_v63, %v297_v45 }
  0xc2   :  { %v1357_v12 = vpop.f32.mrf.mxu2  ;;  %v1362_v14 = vpop.f32.mrf.mxu3 }
  0xc3   :  { %v379_v51 = vadd.f32 %v1332_v0, %v338_v48  ;;  %v271_v48 = vadd.f32 %v1421_v40, %v1320_v59  ;;  %v274_v59 = vadd.f32 %v1421_v40, %v1325_v61 }
  0xc5   :  { %v420_v57 = vadd.f32 %v419_v41, %v379_v51 }
  0xc6   :  { %v1355_v11 = vpop.f32.mrf.mxu1  ;;  %v422_v49 = vpop.f32.mrf.mxu0 }
  0xc7   :  { %v300_v52 = vadd.f32 %v1355_v11, %v259_v47 }
  0xc9   :  { %v341_v58 = vadd.f32 %v1339_v3, %v300_v52 }
  0xca   :  { %v1369_v18 = vpop.f32.mrf.mxu2  ;;  %v1371_v19 = vpop.f32.mrf.mxu3 }
  0xcb   :  { %v382_v5 = vadd.f32 %v1341_v4, %v341_v58 }
  0xcd   :  { %v423_v11 = vadd.f32 %v422_v49, %v382_v5 }
  0xce   :  { %v1367_v17 = vpop.f32.mrf.mxu1  ;;  %v425_v2 = vpop.f32.mrf.mxu0 }
  0xcf   :  { %v303_v63 = vadd.f32 %v1367_v17, %v262_v56 }
  0xd1   :  { %v344_v13 = vadd.f32 %v1348_v7, %v303_v63  ;;  %v268_v7 = vadd.f32 %v1421_v40, %v1308_v55 }
  0xd2   :  { %v1378_v22 = vpop.f32.mrf.mxu2  ;;  %v1383_v25 = vpop.f32.mrf.mxu3 }
  0xd3   :  { %v385_v23 = vadd.f32 %v1350_v8, %v344_v13 }
  0xd5   :  { %v426_v27 = vadd.f32 %v425_v2, %v385_v23 }
  0xd6   :  { %v1376_v21 = vpop.f32.mrf.mxu1  ;;  %v428_v24 = vpop.f32.mrf.mxu0 }
  0xd7   :  { %v306_v4 = vadd.f32 %v1376_v21, %v265_v10  ;;  %v277_v10 = vadd.f32 %v1421_v40, %v1334_v1 }
  0xd9   :  { %v347_v28 = vadd.f32 %v1357_v12, %v306_v4 }
  0xda   :  { %v1396_v30 = vpop.f32.mrf.mxu2  ;;  %v1401_v32 = vpop.f32.mrf.mxu3 }
  0xdb   :  { %v388_v8 = vadd.f32 %v1362_v14, %v347_v28 }
  0xdd   :  { %v429_v45 = vadd.f32 %v428_v24, %v388_v8 }
  0xde   :  { %v1394_v29 = vpop.f32.mrf.mxu1 }
  0xdf   :  { %v309_v21 = vadd.f32 %v1394_v29, %v268_v7 }
  0xe1   :  { %v350_v12 = vadd.f32 %v1369_v18, %v309_v21 }
  0xe2   :  { %v1414_v38 = vpop.f32.mrf.mxu2  ;;  %v1416_v39 = vpop.f32.mrf.mxu3 }
  0xe3   :  { %v391_v51 = vadd.f32 %v1371_v19, %v350_v12 }
  0xe6   :  { %v1412_v37 = vpop.f32.mrf.mxu1 }
  0xe7   :  { %v312_v14 = vadd.f32 %v1412_v37, %v271_v48 }
  0xe9   :  { %v353_v56 = vadd.f32 %v1378_v22, %v312_v14 }
  0xea   :  { %v501_v44 = vpop.f32.mrf.mxu2  ;;  %v542_v46 = vpop.f32.mrf.mxu3 }
  0xee   :  { %v1424_v43 = vpop.f32.mrf.mxu1 }
  0xef   :  { %v315_v19 = vadd.f32 %v1424_v43, %v274_v59 }
  0xf1   :  { %v356_v22 = vadd.f32 %v1396_v30, %v315_v19 }
  0xf2   :  { %v504_v53 = vpop.f32.mrf.mxu2  ;;  %v545_v54 = vpop.f32.mrf.mxu3 }
  0xf6   :  { %v1429_v50 = vpop.f32.mrf.mxu1 }
  0xf7   :  { %v318_v43 = vadd.f32 %v1429_v50, %v277_v10 }
  0xfa   :  { %v507_v0 = vpop.f32.mrf.mxu2  ;;  %v548_v20 = vpop.f32.mrf.mxu3 }
  0xfe   :  { %v460_v60 = vpop.f32.mrf.mxu1 }
  0xff   :  { %v461_v62 = vadd.f32 %v460_v60, %v420_v57 }
 0x101   :  { %v502_v6 = vadd.f32 %v501_v44, %v461_v62  ;;  %v431_v44 = vpop.f32.mrf.mxu0  ;;  %v394_v62 = vadd.f32 %v1383_v25, %v353_v56  ;;  %v397_v25 = vadd.f32 %v1401_v32, %v356_v22 }
 0x102   :  { %v510_v34 = vpop.f32.mrf.mxu2  ;;  %v551_v36 = vpop.f32.mrf.mxu3 }
 0x103   :  { %v543_v9 = vadd.f32 %v542_v46, %v502_v6 }
 0x105   :  { %v566_v15 = vmax.f32 %v543_v9, 0.0 }
 0x106   :  { %v463_v16 = vpop.f32.mrf.mxu1 }
 0x107   :  { %v464_v3 = vadd.f32 %v463_v16, %v423_v11  ;;  %683 = vmatmul.msk.f32.vlgmr.msra.gmra.mxu0 %vm591_vm2, %v566_v15 }
 0x109   :  { %v505_v17 = vadd.f32 %v504_v53, %v464_v3  ;;  %v434_v57 = vpop.f32.mrf.mxu0  ;;  %v359_v3 = vadd.f32 %v1414_v38, %v318_v43 }
 0x10a   :  { %v513_v49 = vpop.f32.mrf.mxu2  ;;  %v554_v52 = vpop.f32.mrf.mxu3  ;;  %v435_v6 = vadd.f32 %v434_v57, %v394_v62 }
 0x10b   :  { %v546_v26 = vadd.f32 %v545_v54, %v505_v17  ;;  %v432_v54 = vadd.f32 %v431_v44, %v391_v51  ;;  %v400_v1 = vadd.f32 %v1416_v39, %v359_v3  ;;  %v721_v39 = vld [vmem:[%s1510_s4] ss:$0 sm:$0xff] }
 0x10d   :  { %v567_v31 = vmax.f32 %v546_v26, 0.0 }
 0x10e   :  { %v466_v33 = vpop.f32.mrf.mxu1 }
 0x10f   :  { %v467_v35 = vadd.f32 %v466_v33, %v426_v27  ;;  %684 = vmatmul.msk.f32.gmra.mxu0 %vm591_vm2, %v567_v31 }
 0x111   :  { %v508_v41 = vadd.f32 %v507_v0, %v467_v35  ;;  %v437_v11 = vpop.f32.mrf.mxu0 }
 0x112   :  { %v516_v2 = vpop.f32.mrf.mxu2  ;;  %v557_v63 = vpop.f32.mrf.mxu3 }
 0x113   :  { %v549_v42 = vadd.f32 %v548_v20, %v508_v41  ;;  %v438_v20 = vadd.f32 %v437_v11, %v397_v25 }
 0x115   :  { %v568_v46 = vmax.f32 %v549_v42, 0.0 }
 0x116   :  { %v469_v47 = vpop.f32.mrf.mxu1 }
 0x117   :  { %v470_v55 = vadd.f32 %v469_v47, %v429_v45  ;;  %685 = vmatmul.msk.f32.gmra.mxu0 %vm591_vm2, %v568_v46 }
 0x119   :  { %v511_v29 = vadd.f32 %v510_v34, %v470_v55  ;;  %v440_v24 = vpop.f32.mrf.mxu0 }
 0x11a   :  { %v519_v16 = vpop.f32.mrf.mxu2  ;;  %v560_v4 = vpop.f32.mrf.mxu3  ;;  %v441_v32 = vadd.f32 %v440_v24, %v400_v1 }
 0x11b   :  { %v552_v53 = vadd.f32 %v551_v36, %v511_v29 }
 0x11d   :  { %v569_v18 = vmax.f32 %v552_v53, 0.0 }
 0x11e   :  { %v472_v58 = vpop.f32.mrf.mxu1 }
 0x11f   :  { %v473_v60 = vadd.f32 %v472_v58, %v432_v54  ;;  %686 = vmatmul.msk.f32.gmra.mxu0 %vm591_vm2, %v569_v18 }
 0x121   :  { %v514_v37 = vadd.f32 %v513_v49, %v473_v60 }
 0x122   :  { %v522_v28 = vpop.f32.mrf.mxu2  ;;  %v563_v33 = vpop.f32.mrf.mxu3 }
 0x123   :  { %v555_v5 = vadd.f32 %v554_v52, %v514_v37 }
 0x125   :  { %v570_v9 = vmax.f32 %v555_v5, 0.0 }
 0x126   :  { %v475_v0 = vpop.f32.mrf.mxu1 }
 0x127   :  { %v476_v61 = vadd.f32 %v475_v0, %v435_v6  ;;  %687 = vmatmul.msk.f32.gmra.mxu0 %vm591_vm2, %v570_v9 }
 0x129   :  { %v517_v13 = vadd.f32 %v516_v2, %v476_v61 }
 0x12b   :  { %v558_v15 = vadd.f32 %v557_v63, %v517_v13 }
 0x12d   :  { %v571_v30 = vmax.f32 %v558_v15, 0.0 }
 0x12e   :  { %v478_v23 = vpop.f32.mrf.mxu1 }
 0x12f   :  { %v479_v17 = vadd.f32 %v478_v23, %v438_v20  ;;  %688 = vmatmul.msk.f32.gmra.mxu0 %vm591_vm2, %v571_v30 }
 0x131   :  { %v520_v40 = vadd.f32 %v519_v16, %v479_v17 }
 0x133   :  { %v561_v26 = vadd.f32 %v560_v4, %v520_v40 }
 0x135   :  { %v572_v27 = vmax.f32 %v561_v26, 0.0 }
 0x136   :  { %v481_v50 = vpop.f32.mrf.mxu1 }
 0x137   :  { %v482_v31 = vadd.f32 %v481_v50, %v441_v32  ;;  %689 = vmatmul.msk.f32.vlgmr.msra.gmra.mxu2 %vm591_vm2, %v572_v27 }
 0x139   :  { %v523_v38 = vadd.f32 %v522_v28, %v482_v31 }
 0x13b   :  { %v564_v34 = vadd.f32 %v563_v33, %v523_v38 }
 0x13d   :  { %v573_v7 = vmax.f32 %v564_v34, 0.0 }
 0x13f   :  { %690 = vmatmul.msk.f32.gmra.mxu2 %vm591_vm2, %v573_v7 }
 0x184   :  { %v637_v35 = vpop.f32.mrf.mxu0 }
 0x185   :  { %v638_v36 = vadd.f32 %v721_v39, %v637_v35 }
 0x187   :  { %662 = vst.msk [vmem:[%s1511_s5] sm:$0xff] %vm661_vm3, %v638_v36 }
 0x18c   :  { %v640_v8 = vpop.f32.mrf.mxu0 }
 0x18d   :  { %v641_v21 = vadd.f32 %v721_v39, %v640_v8 }
 0x18f   :  { %663 = vst.msk [vmem:[%s1511_s5 + $0x8] sm:$0xff] %vm661_vm3, %v641_v21 }
 0x194   :  { %v643_v41 = vpop.f32.mrf.mxu0 }
 0x195   :  { %v644_v42 = vadd.f32 %v721_v39, %v643_v41 }
 0x197   :  { %664 = vst.msk [vmem:[%s1511_s5 + $0x10] sm:$0xff] %vm661_vm3, %v644_v42 }
 0x19c   :  { %v646_v44 = vpop.f32.mrf.mxu0 }
 0x19d   :  { %v647_v45 = vadd.f32 %v721_v39, %v646_v44 }
 0x19f   :  { %665 = vst.msk [vmem:[%s1511_s5 + $0x18] sm:$0xff] %vm661_vm3, %v647_v45 }
 0x1a4   :  { %v649_v12 = vpop.f32.mrf.mxu0 }
 0x1a5   :  { %v650_v46 = vadd.f32 %v721_v39, %v649_v12 }
 0x1a7   :  { %666 = vst.msk [vmem:[%s1511_s5 + $0x20] sm:$0xff] %vm661_vm3, %v650_v46 }
 0x1ac   :  { %v652_v47 = vpop.f32.mrf.mxu0 }
 0x1ad   :  { %v653_v48 = vadd.f32 %v721_v39, %v652_v47 }
 0x1af   :  { %667 = vst.msk [vmem:[%s1511_s5 + $0x28] sm:$0xff] %vm661_vm3, %v653_v48 }
 0x1ba   :  { %v655_v55 = vpop.f32.mrf.mxu2 }
 0x1bb   :  { %v656_v49 = vadd.f32 %v721_v39, %v655_v55 }
 0x1bd   :  { %668 = vst.msk [vmem:[%s1511_s5 + $0x30] sm:$0xff] %vm661_vm3, %v656_v49 }
 0x1c2   :  { %v658_v51 = vpop.f32.mrf.mxu2 }
 0x1c3   :  { %v659_v14 = vadd.f32 %v721_v39, %v658_v51 }
 0x1c5   :  { %669 = vst.msk [vmem:[%s1511_s5 + $0x38] sm:$0xff] %vm661_vm3, %v659_v14 }

</bundles_post_ra>
